<compile_context>
chip_gen: v5e
topology: v5e:2x2
jax: 0.10.0
libtpu: 0.0.40
codegen_flags: <defaults>
</compile_context>

<pallas_src>
import jax
import jax.numpy as jnp
from jax.experimental import pallas as pl
from jax.experimental.pallas import tpu as pltpu


def make_mixprop_kernel(*, n_nodes, c_in, t_len, gdep, alpha):
    """Kernel operating on one batch element in (node, channel*time) lane layout."""

    def kernel(x_ref, adj_ref, se_a_ref, se_b_ref, wbig_ref, bias_ref, out_ref):
        x = x_ref[0]                                          # (N, c_in*T)

        # --- adjacency normalization:  a = (adj + I) / rowsum(adj + I) ---------
        r = jax.lax.broadcasted_iota(jnp.int32, (n_nodes, n_nodes), 0)
        c = jax.lax.broadcasted_iota(jnp.int32, (n_nodes, n_nodes), 1)
        eye = jnp.where(r == c, 1.0, 0.0).astype(jnp.float32)
        adj_hat = adj_ref[...] + eye
        d = jnp.sum(adj_hat, axis=1, keepdims=True)           # (N, 1)
        a = adj_hat / d                                       # (N, N)

        # --- mixprop: one full-lane-width matmul per hop, concat along lanes ---
        ax = alpha * x                                        # hoisted out of hop loop
        beta = 1.0 - alpha
        h = x
        hs = [h]
        for _ in range(gdep):                                 # static, small unroll
            h = ax + beta * jnp.dot(a, h, preferred_element_type=jnp.float32)
            hs.append(h)
        ho = jnp.concatenate(hs, axis=1)                      # (N, C*T)

        # --- SEAttention (pool+fc1 and fc2+expand folded into 2 matmuls) -------
        row_sum = jnp.sum(ho, axis=0, keepdims=True)          # (1, C*T)  (XLU reduce)
        z = jnp.maximum(
            jnp.dot(row_sum, se_a_ref[...], preferred_element_type=jnp.float32),
            0.0)                                              # (1, Cr)
        scale = jax.nn.sigmoid(
            jnp.dot(z, se_b_ref[...], preferred_element_type=jnp.float32))  # (1, C*T)
        ho = ho * scale                                       # per-channel rescale

        # --- 1x1-conv MLP as a single matmul with the kron-expanded weight -----
        out = jnp.dot(ho, wbig_ref[...],
                      preferred_element_type=jnp.float32) + bias_ref[...]  # (N, c_out*T)
        out_ref[0] = out.astype(out_ref.dtype)

    return kernel


def mixprop_attention(x, adj, params, *, gdep, alpha):
    """x: (B, c_in, N, T) f32, adj: (N, N) f32.  Returns (B, c_out, N, T)."""
    w1, w2, wm, bm = params        # w1:(Cr,C) w2:(C,Cr) wm:(c_out,C) bm:(c_out,)
    B, c_in, N, T = x.shape
    C = (gdep + 1) * c_in
    Cr = w1.shape[0]
    c_out = wm.shape[0]

    # ---- host-side layout plumbing (constant-folded, lane-dense operands) -----
    # data: (B, c_in, N, T) -> (B, N, c_in*T); lane index = c*T + t.
    x_t = jnp.transpose(x, (0, 2, 1, 3)).reshape(B, N, c_in * T)

    eye_c = jnp.eye(C, dtype=jnp.float32)
    # pool[c*T+t, c'] = delta(c,c') / (N*T)  (mean over N,T given the row_sum over N)
    pool = jnp.kron(eye_c, jnp.ones((T, 1), jnp.float32)) / float(N * T)   # (C*T, C)
    # expand[c, c'*T+t] = delta(c,c')  (replicate one scale per channel across T lanes)
    expand = jnp.kron(eye_c, jnp.ones((1, T), jnp.float32))                # (C, C*T)
    # Fold SE constants:   z1 = relu(row_sum @ (pool @ W1.T))
    #                      scale = sigmoid(z1 @ (W2.T @ expand))   (sigmoid commutes w/ replication)
    se_a = pool @ w1.T                                                     # (C*T, Cr)
    se_b = w2.T @ expand                                                   # (Cr, C*T)
    # 1x1 conv: Wbig[c*T+t, o*T+t'] = Wm[o,c] * delta(t,t')
    wbig = jnp.kron(wm.T, jnp.eye(T, dtype=jnp.float32))                   # (C*T, c_out*T)
    bvec = jnp.kron(bm, jnp.ones((T,), jnp.float32)).reshape(1, c_out * T)

    kernel = make_mixprop_kernel(n_nodes=N, c_in=c_in, t_len=T, gdep=gdep, alpha=alpha)

    grid_spec = pltpu.PrefetchScalarGridSpec(
        num_scalar_prefetch=0,
        grid=(B,),
        in_specs=[
            pl.BlockSpec((1, N, c_in * T), lambda b: (b, 0, 0)),
            pl.BlockSpec((N, N), lambda b: (0, 0)),
            pl.BlockSpec((C * T, Cr), lambda b: (0, 0)),
            pl.BlockSpec((Cr, C * T), lambda b: (0, 0)),
            pl.BlockSpec((C * T, c_out * T), lambda b: (0, 0)),
            pl.BlockSpec((1, c_out * T), lambda b: (0, 0)),
        ],
        out_specs=pl.BlockSpec((1, N, c_out * T), lambda b: (b, 0, 0)),
    )

    out_flat = pl.pallas_call(
        kernel,
        grid_spec=grid_spec,
        out_shape=jax.ShapeDtypeStruct((B, N, c_out * T), jnp.float32),
        compiler_params=pltpu.CompilerParams(dimension_semantics=("parallel",)),
    )(x_t, adj, se_a, se_b, wbig, bvec)

    # (B, N, c_out*T) -> (B, c_out, N, T)
    return jnp.transpose(out_flat.reshape(B, N, c_out, T), (0, 2, 1, 3))


def reference_mixprop(x, adj, params, *, gdep, alpha):
    """Pure-JAX reference mirroring the PyTorch forward."""
    w1, w2, wm, bm = params
    B, c_in, N, T = x.shape
    adj_hat = adj + jnp.eye(N, dtype=adj.dtype)
    d = adj_hat.sum(axis=1)
    a = adj_hat / d[:, None]
    h = x
    outs = [h]
    for _ in range(gdep):
        h = alpha * x + (1.0 - alpha) * jnp.einsum('ncwl,vw->ncvl', h, a)
        outs.append(h)
    ho = jnp.concatenate(outs, axis=1)                        # (B, C, N, T)
    y = ho.mean(axis=(2, 3))                                  # (B, C)
    y = jax.nn.sigmoid(jnp.maximum(y @ w1.T, 0.0) @ w2.T)     # (B, C)
    ho = ho * y[:, :, None, None]
    out = jnp.einsum('oc,bcnt->bont', wm, ho) + bm[None, :, None, None]
    return out


if __name__ == "__main__":
    # Small shapes consistent with the module: x (B, c_in, N, T), adj (N, N).
    # reduction is hard-coded to 16 in SEAttention, so C = (gdep+1)*c_in must be >= 16.
    B, c_in, N, T = 2, 8, 16, 16
    gdep, c_out, alpha, reduction = 3, 16, 0.05, 16
    C = (gdep + 1) * c_in          # 32
    Cr = C // reduction            # 2

    key = jax.random.PRNGKey(0)
    kx, ka, k1, k2, k3, k4 = jax.random.split(key, 6)

    x = jax.random.normal(kx, (B, c_in, N, T), dtype=jnp.float32)
    adj = jax.nn.relu(jax.random.normal(ka, (N, N), dtype=jnp.float32))  # non-negative graph

    # Parameters (PyTorch layouts): SE fc1 (Cr,C), fc2 (C,Cr); 1x1-conv (c_out,C) + bias.
    w1 = jax.random.normal(k1, (Cr, C), dtype=jnp.float32) * 0.1
    w2 = jax.random.normal(k2, (C, Cr), dtype=jnp.float32) * 0.1
    wm = jax.random.normal(k3, (c_out, C), dtype=jnp.float32) * 0.1
    bm = jax.random.normal(k4, (c_out,), dtype=jnp.float32) * 0.1
    params = (w1, w2, wm, bm)

    out = mixprop_attention(x, adj, params, gdep=gdep, alpha=alpha)
    jax.block_until_ready(out)

    out_ref = reference_mixprop(x, adj, params, gdep=gdep, alpha=alpha)
    assert out.shape == (B, c_out, N, T), "bad output shape"
    assert jnp.allclose(out, out_ref, atol=1e-3, rtol=1e-3), "output mismatch vs reference"

    print("KERNEL_OK")
</pallas_src>

<mosaic_0001>
module attributes {stable_mosaic.version = 11 : i64} {
  func.func @kernel(%arg0: i32, %arg1: memref<1x16x128xf32, #tpu.memory_space<vmem>>, %arg2: memref<16x16xf32, #tpu.memory_space<vmem>>, %arg3: memref<512x2xf32, #tpu.memory_space<vmem>>, %arg4: memref<2x512xf32, #tpu.memory_space<vmem>>, %arg5: memref<512x256xf32, #tpu.memory_space<vmem>>, %arg6: memref<1x256xf32, #tpu.memory_space<vmem>>, %arg7: memref<1x16x256xf32, #tpu.memory_space<vmem>>) attributes {dimension_semantics = [#tpu.dimension_semantics<parallel>], iteration_bounds = array<i64: 2>, scalar_prefetch = 0 : i64, scratch_operands = 0 : i64, tpu.core_type = #tpu.core_type<tc>, window_params = [{transform_indices = @transform_0, window_bounds = array<i64: 1, 16, 128>}, {pipeline_mode = #tpu.pipeline_mode<synchronous>, transform_indices = @transform_1, window_bounds = array<i64: 16, 16>}, {pipeline_mode = #tpu.pipeline_mode<synchronous>, transform_indices = @transform_2, window_bounds = array<i64: 512, 2>}, {pipeline_mode = #tpu.pipeline_mode<synchronous>, transform_indices = @transform_3, window_bounds = array<i64: 2, 512>}, {pipeline_mode = #tpu.pipeline_mode<synchronous>, transform_indices = @transform_4, window_bounds = array<i64: 512, 256>}, {pipeline_mode = #tpu.pipeline_mode<synchronous>, transform_indices = @transform_5, window_bounds = array<i64: 1, 256>}, {transform_indices = @transform_6, window_bounds = array<i64: 1, 16, 256>}]} {
    %c0 = arith.constant 0 : index
    %c0_0 = arith.constant 0 : index
    %c0_1 = arith.constant 0 : index
    %0 = vector.load %arg1[%c0, %c0_0, %c0_1] : memref<1x16x128xf32, #tpu.memory_space<vmem>>, vector<1x16x128xf32>
    %1 = vector.shape_cast %0 : vector<1x16x128xf32> to vector<16x128xf32>
    %2 = tpu.iota {dimensions = array<i32: 0>} : vector<16x16xi32>
    %3 = tpu.iota {dimensions = array<i32: 1>} : vector<16x16xi32>
    %4 = arith.cmpi eq, %2, %3 : vector<16x16xi32>
    %cst = arith.constant 1.000000e+00 : f32
    %cst_2 = arith.constant 0.000000e+00 : f32
    %5 = vector.broadcast %cst : f32 to vector<16x16xf32>
    %6 = vector.broadcast %cst_2 : f32 to vector<16x16xf32>
    %7 = arith.select %4, %5, %6 : vector<16x16xi1>, vector<16x16xf32>
    %c0_3 = arith.constant 0 : index
    %c0_4 = arith.constant 0 : index
    %8 = vector.load %arg2[%c0_3, %c0_4] : memref<16x16xf32, #tpu.memory_space<vmem>>, vector<16x16xf32>
    %9 = arith.addf %8, %7 : vector<16x16xf32>
    %cst_5 = arith.constant dense<0.000000e+00> : vector<16xf32>
    %10 = vector.multi_reduction <add>, %9, %cst_5 [1] : vector<16x16xf32> to vector<16xf32>
    %11 = vector.shape_cast %10 : vector<16xf32> to vector<16x1xf32>
    %12 = vector.broadcast %11 : vector<16x1xf32> to vector<16x16xf32>
    %13 = arith.divf %9, %12 : vector<16x16xf32>
    %cst_6 = arith.constant 5.000000e-02 : f32
    %14 = vector.broadcast %cst_6 : f32 to vector<16x128xf32>
    %15 = arith.mulf %14, %1 : vector<16x128xf32>
    %cst_7 = arith.constant dense<0.000000e+00> : vector<16x128xf32>
    %16 = tpu.matmul %13, %1, %cst_7 {dimension_numbers = #tpu.dot_dimension_numbers<[1], [0], [0], [1], [0, 0, 1, 1], [], []>} : vector<16x16xf32>, vector<16x128xf32>, vector<16x128xf32> -> vector<16x128xf32>
    %cst_8 = arith.constant 0.949999988 : f32
    %17 = vector.broadcast %cst_8 : f32 to vector<16x128xf32>
    %18 = arith.mulf %17, %16 : vector<16x128xf32>
    %19 = arith.addf %15, %18 : vector<16x128xf32>
    %cst_9 = arith.constant dense<0.000000e+00> : vector<16x128xf32>
    %20 = tpu.matmul %13, %19, %cst_9 {dimension_numbers = #tpu.dot_dimension_numbers<[1], [0], [0], [1], [0, 0, 1, 1], [], []>} : vector<16x16xf32>, vector<16x128xf32>, vector<16x128xf32> -> vector<16x128xf32>
    %cst_10 = arith.constant 0.949999988 : f32
    %21 = vector.broadcast %cst_10 : f32 to vector<16x128xf32>
    %22 = arith.mulf %21, %20 : vector<16x128xf32>
    %23 = arith.addf %15, %22 : vector<16x128xf32>
    %cst_11 = arith.constant dense<0.000000e+00> : vector<16x128xf32>
    %24 = tpu.matmul %13, %23, %cst_11 {dimension_numbers = #tpu.dot_dimension_numbers<[1], [0], [0], [1], [0, 0, 1, 1], [], []>} : vector<16x16xf32>, vector<16x128xf32>, vector<16x128xf32> -> vector<16x128xf32>
    %cst_12 = arith.constant 0.949999988 : f32
    %25 = vector.broadcast %cst_12 : f32 to vector<16x128xf32>
    %26 = arith.mulf %25, %24 : vector<16x128xf32>
    %27 = arith.addf %15, %26 : vector<16x128xf32>
    %28 = tpu.concatenate %1, %19, %23, %27 in 1 : vector<16x128xf32>, vector<16x128xf32>, vector<16x128xf32>, vector<16x128xf32> -> vector<16x512xf32>
    %cst_13 = arith.constant dense<0.000000e+00> : vector<512xf32>
    %29 = vector.multi_reduction <add>, %28, %cst_13 [0] : vector<16x512xf32> to vector<512xf32>
    %30 = vector.shape_cast %29 : vector<512xf32> to vector<1x512xf32>
    %c0_14 = arith.constant 0 : index
    %c0_15 = arith.constant 0 : index
    %31 = vector.load %arg3[%c0_14, %c0_15] : memref<512x2xf32, #tpu.memory_space<vmem>>, vector<512x2xf32>
    %cst_16 = arith.constant dense<0.000000e+00> : vector<1x2xf32>
    %32 = tpu.matmul %30, %31, %cst_16 {dimension_numbers = #tpu.dot_dimension_numbers<[1], [0], [0], [1], [0, 0, 1, 1], [], []>} : vector<1x512xf32>, vector<512x2xf32>, vector<1x2xf32> -> vector<1x2xf32>
    %cst_17 = arith.constant 0.000000e+00 : f32
    %33 = vector.broadcast %cst_17 : f32 to vector<1x2xf32>
    %34 = arith.maximumf %32, %33 : vector<1x2xf32>
    %c0_18 = arith.constant 0 : index
    %c0_19 = arith.constant 0 : index
    %35 = vector.load %arg4[%c0_18, %c0_19] : memref<2x512xf32, #tpu.memory_space<vmem>>, vector<2x512xf32>
    %cst_20 = arith.constant dense<0.000000e+00> : vector<1x512xf32>
    %36 = tpu.matmul %34, %35, %cst_20 {dimension_numbers = #tpu.dot_dimension_numbers<[1], [0], [0], [1], [0, 0, 1, 1], [], []>} : vector<1x2xf32>, vector<2x512xf32>, vector<1x512xf32> -> vector<1x512xf32>
    %37 = arith.negf %36 : vector<1x512xf32>
    %38 = math.exp %37 : vector<1x512xf32>
    %cst_21 = arith.constant 1.000000e+00 : f32
    %39 = vector.broadcast %cst_21 : f32 to vector<1x512xf32>
    %40 = arith.addf %39, %38 : vector<1x512xf32>
    %41 = arith.divf %39, %40 : vector<1x512xf32>
    %42 = vector.broadcast %41 : vector<1x512xf32> to vector<16x512xf32>
    %43 = arith.mulf %28, %42 : vector<16x512xf32>
    %c0_22 = arith.constant 0 : index
    %c0_23 = arith.constant 0 : index
    %44 = vector.load %arg5[%c0_22, %c0_23] : memref<512x256xf32, #tpu.memory_space<vmem>>, vector<512x256xf32>
    %cst_24 = arith.constant dense<0.000000e+00> : vector<16x256xf32>
    %45 = tpu.matmul %43, %44, %cst_24 {dimension_numbers = #tpu.dot_dimension_numbers<[1], [0], [0], [1], [0, 0, 1, 1], [], []>} : vector<16x512xf32>, vector<512x256xf32>, vector<16x256xf32> -> vector<16x256xf32>
    %c0_25 = arith.constant 0 : index
    %c0_26 = arith.constant 0 : index
    %46 = vector.load %arg6[%c0_25, %c0_26] : memref<1x256xf32, #tpu.memory_space<vmem>>, vector<1x256xf32>
    %47 = vector.broadcast %46 : vector<1x256xf32> to vector<16x256xf32>
    %48 = arith.addf %45, %47 : vector<16x256xf32>
    %c0_27 = arith.constant 0 : index
    %c0_28 = arith.constant 0 : index
    %c0_29 = arith.constant 0 : index
    %49 = vector.load %arg7[%c0_27, %c0_28, %c0_29] : memref<1x16x256xf32, #tpu.memory_space<vmem>>, vector<1x16x256xf32>
    %50 = vector.shape_cast %49 : vector<1x16x256xf32> to vector<16x256xf32>
    %51 = vector.shape_cast %48 : vector<16x256xf32> to vector<1x16x256xf32>
    tpu.vector_store %arg7[%c0_27, %c0_28, %c0_29], %51 {strides = array<i32>} : memref<1x16x256xf32, #tpu.memory_space<vmem>>, vector<1x16x256xf32>,
    return
  }
  func.func @transform_0(%arg0: i32) -> (i32, i32, i32) {
    %c0_i32 = arith.constant 0 : i32
    %c0_i32_0 = arith.constant 0 : i32
    %c0_i32_1 = arith.constant 0 : i32
    return %arg0, %c0_i32, %c0_i32_0 : i32, i32, i32
  }
  func.func @transform_1(%arg0: i32) -> (i32, i32) {
    %c0_i32 = arith.constant 0 : i32
    %c0_i32_0 = arith.constant 0 : i32
    %c0_i32_1 = arith.constant 0 : i32
    return %c0_i32, %c0_i32_0 : i32, i32
  }
  func.func @transform_2(%arg0: i32) -> (i32, i32) {
    %c0_i32 = arith.constant 0 : i32
    %c0_i32_0 = arith.constant 0 : i32
    %c0_i32_1 = arith.constant 0 : i32
    return %c0_i32, %c0_i32_0 : i32, i32
  }
  func.func @transform_3(%arg0: i32) -> (i32, i32) {
    %c0_i32 = arith.constant 0 : i32
    %c0_i32_0 = arith.constant 0 : i32
    %c0_i32_1 = arith.constant 0 : i32
    return %c0_i32, %c0_i32_0 : i32, i32
  }
  func.func @transform_4(%arg0: i32) -> (i32, i32) {
    %c0_i32 = arith.constant 0 : i32
    %c0_i32_0 = arith.constant 0 : i32
    %c0_i32_1 = arith.constant 0 : i32
    return %c0_i32, %c0_i32_0 : i32, i32
  }
  func.func @transform_5(%arg0: i32) -> (i32, i32) {
    %c0_i32 = arith.constant 0 : i32
    %c0_i32_0 = arith.constant 0 : i32
    %c0_i32_1 = arith.constant 0 : i32
    return %c0_i32, %c0_i32_0 : i32, i32
  }
  func.func @transform_6(%arg0: i32) -> (i32, i32, i32) {
    %c0_i32 = arith.constant 0 : i32
    %c0_i32_0 = arith.constant 0 : i32
    %c0_i32_1 = arith.constant 0 : i32
    return %arg0, %c0_i32, %c0_i32_0 : i32, i32, i32
  }
}

</mosaic_0001>

<bundles_post_ra>
// kernel: tpu_custom_call.1
= control target key start
LH: loop header
LB: loop body
LE: loop exit
PB: predicated region body
PF: predicated region fallthrough
CT: control target
= control target key end

     0   :  { %11 = vsyncpa [#allocation3], 0  ;;  %s1849_s0 = inlined_call_operand.vmem [shape: f32[2,16,128], index: 0, kind: input, shape index: {}]   ;;  %s1850_s1 = inlined_call_operand.vmem [shape: f32[16,16], index: 1, kind: input, shape index: {}]   ;;  %s1851_s2 = inlined_call_operand.vmem [shape: f32[512,2], index: 2, kind: input, shape index: {}]   ;;  %s1852_s3 = inlined_call_operand.vmem [shape: f32[2,512], index: 3, kind: input, shape index: {}]   ;;  %s1853_s4 = inlined_call_operand.hbm [shape: f32[512,256], index: 4, kind: input, shape index: {}]   ;;  %s1854_s5 = inlined_call_operand.vmem [shape: f32[1,256], index: 5, kind: input, shape index: {}]   ;;  %s1855_s6 = inlined_call_operand.hbm [shape: f32[2,16,256], index: 6, kind: output, shape index: {}]  }
   0x1   :  { %12 = vsyncpa [#allocation4], 0 }
   0x2   :  { %14 = vsyncpa [#allocation4 + $0x1], 0  ;;  %s1431_s21 = smov 0   ;;  %s1433_s22 = smov 0  }
   0x3   :  { %s1435_s23 = smov 0   ;;  %s1437_s24 = smov 0  }
   0x4 LB: > { %s1452_s25 = sadd.s32 4294967295, %s1388_s24   ;;  %s1181_s26 = sadd.s32 4294967294, %s1388_s24   ;;  %s1388_s24 = sphi %s1437_s24, %s1861_s24   ;;  %s1384_s23 = sphi %s1435_s23, %s1860_s23   ;;  %s1380_s22 = sphi %s1433_s22, %s1859_s22   ;;  %s1376_s21 = sphi %s1431_s21, %s1858_s21  }
   0x5   : > { %s1456_s27 = sadd.s32 1, %s1388_s24   ;;  %s158_s28 = sadd.s32 1, %s1384_s23 }
   0x6   : > { %s155_s29 = ssub.s32 %s1388_s24, %s1456_s27  ;;  %p168_p0 = scmp.ne.s32.totalorder %s1384_s23, %s1380_s22 }
   0x7   : > { %p156_p1 = scmp.eq.s32.totalorder %s155_s29, 0  ;;  %p169_p2 = scmp.eq.s32.totalorder %s1452_s25, 1 }
   0x8   : > { %p174_p3 = scmp.ne.s32.totalorder %s1380_s22, %s1376_s21  ;;  %p175_p4 = scmp.eq.s32.totalorder %s1181_s26, 1 }
   0x9   : > { %s1467_s30 = scalar_select %p156_p1, %s1384_s23, %s158_s28  }
   0xa   : > { %p1469_p5 = por %p169_p2, %p168_p0  ;;  %p1473_p6 = por %p175_p4, %p174_p3 }
   0xb   : > { %p1182_p7 = scmp.ge.s32.totalorder %s1388_s24, 1  ;;  %p182_p8 = scmp.lt.s32.totalorder %s1388_s24, 3 }
   0xc   : > { %p1229_p9 = scmp.eq.s32.totalorder %s1452_s25, 0  ;;  %s202_s11 = sshll.u32 %s1853_s4, 4  ;;  %s203_s11 = int_to_ptr.hbm [resolvable:$true] %s202_s11 }
   0xd   : > { %p183_p10 = pnand %p1182_p7, %p182_p8  ;;  %s1390_s12 = smov [#allocation2]  }
   0xe   : > { %s204_s13 = sshll.u32 %s1390_s12, 4  ;;  %s1391_s14 = smov 256   ;;  %s205_s13 = int_to_ptr.vmem [resolvable:$true] %s204_s13 }
   0xf   : > { %p1221_p11 = pneg %p183_p10  ;;  %s1392_s15 = smov 16  }
  0x10   : > { %231 = sbr.rel (%p183_p10) target bundleno = 1074 (0x432), region = 44 }
  0x11   : > { %p1222_p12 = pnand %p1229_p9, %p1221_p11 }
  0x13   : > { %1224 = dma.hbm_to_vmem [thread:$0]  (!%p1222_p12), %s203_s11, 16384, %s205_s13, [#allocation3], %s1391_s14, %s1391_s14, %s1392_s15  }
  0x15   : > { %1367 = dma.done.wait (%p1229_p9), [#allocation3], 16384  }
  0x16   : > { %1369 = vsyncadd (%p1229_p9), [#allocation3], 4294950912  ;;  %v269_v0 = vlaneseq  ;;  %v1393_v4 = vmov 0.0   ;;  %v278_v6 = vld [vmem:[%s1850_s1] sm:$0xff]  ;;  %vm282_vm2 = vcmask 130048   ;;  %v279_v9 = vld [vmem:[%s1850_s1 + $0x8] sm:$0xff] }
  0x17   : > { %p262_p13 = scmp.lt.s32.totalorder %s1452_s25, 1  ;;  %v451_v15 = vld [vmem:[%s1851_s2 + $0x78] sm:$0xff]  ;;  %v450_v16 = vld [vmem:[%s1851_s2 + $0x70] sm:$0xff]  ;;  %v449_v18 = vld [vmem:[%s1851_s2 + $0x68] sm:$0xff]  ;;  %vm592_vm11 = vcmask 1041408   ;;  %vm588_vm12 = vcmask 15360  }
  0x18   : > { %v270_v1 = vshrl.u32 %v269_v0, 7  ;;  %v273_v2 = vand.u32 127, %v269_v0  ;;  %500 = vmatpush.msra.mxu3 %v451_v15  ;;  %v467_v17 = vld [vmem:[%s1851_s2 + $0xf8] sm:$0xff]  ;;  %v466_v19 = vld [vmem:[%s1851_s2 + $0xf0] sm:$0xff]  ;;  %v448_v21 = vld [vmem:[%s1851_s2 + $0x60] sm:$0xff]  ;;  %s1214_s18 = sshll.u32 %s1452_s25, 5 }
  0x19   : > { %s263_s20 = scalar_select %p262_p13, %s1452_s25, 1  ;;  %v447_v22 = vld [vmem:[%s1851_s2 + $0x58] sm:$0xff]  ;;  %v446_v46 = vld [vmem:[%s1851_s2 + $0x50] sm:$0xff]  ;;  %v465_v47 = vld [vmem:[%s1851_s2 + $0xe8] sm:$0xff] }
  0x1a   : > { %vm274_vm0 = vcmp.eq.s32.totalorder %v270_v1, %v273_v2  ;;  %v271_v3 = vadd.s32 8, %v270_v1  ;;  %501 = vmatpush.msra.mxu3 %v450_v16  ;;  %v445_v48 = vld [vmem:[%s1851_s2 + $0x48] sm:$0xff]  ;;  %v464_v49 = vld [vmem:[%s1851_s2 + $0xe0] sm:$0xff]  ;;  %v463_v51 = vld [vmem:[%s1851_s2 + $0xd8] sm:$0xff]  ;;  %s1342_s14 = scalar_lea.hbm %s1855_s6, 64 }
  0x1b   : > { %v276_v5 = vsel %vm274_vm0, 1.0, %v1393_v4  ;;  %s1213_s26 = sshll.u32 %s263_s20, 4  ;;  %v444_v50 = vld [vmem:[%s1851_s2 + $0x40] sm:$0xff]  ;;  %v443_v52 = vld [vmem:[%s1851_s2 + $0x38] sm:$0xff]  ;;  %v462_v53 = vld [vmem:[%s1851_s2 + $0xd0] sm:$0xff] }
  0x1c   : > { %vm275_vm1 = vcmp.eq.s32.totalorder %v271_v3, %v273_v2  ;;  %v280_v7 = vadd.f32 %v278_v6, %v276_v5  ;;  %s1502_s9 = scalar_lea.vmem %s1849_s0, %s1213_s26  ;;  %502 = vmatpush.msra.mxu3 %v449_v18  ;;  %v442_v54 = vld [vmem:[%s1851_s2 + $0x30] sm:$0xff]  ;;  %v461_v55 = vld [vmem:[%s1851_s2 + $0xc8] sm:$0xff]  ;;  %v460_v58 = vld [vmem:[%s1851_s2 + $0xc0] sm:$0xff]  ;;  %s1103_s26 = scalar_lea.hbm %s1855_s6, %s1214_s18 }
  0x1d   : > { %v277_v8 = vsel %vm275_vm1, 1.0, %v1393_v4  ;;  %v1505_v13 = vld [vmem:[%s1502_s9 + $0x8] sm:$0xff]  ;;  %v1509_v14 = vld [vmem:[%s1502_s9] sm:$0xff]  ;;  %v459_v61 = vld [vmem:[%s1851_s2 + $0xb8] sm:$0xff]  ;;  %s1106_s29 = sshll.u32 %s1103_s26, 4  ;;  %s1107_s29 = int_to_ptr.hbm [resolvable:$true] %s1106_s29 }
  0x1e   : > { %v283_v10 = vsel %vm282_vm2, %v280_v7, 0.0  ;;  %v281_v11 = vadd.f32 %v279_v9, %v277_v8  ;;  %341 = vmatpush.msra.mxu0 %v1505_v13  ;;  %503 = vmatpush.msra.mxu3 %v448_v21  ;;  %v408_v56 = vadd.f32 %v1505_v13, %v1509_v14  ;;  %v441_v57 = vld [vmem:[%s1851_s2 + $0x28] sm:$0xff]  ;;  %v440_v60 = vld [vmem:[%s1851_s2 + $0x20] sm:$0xff]  ;;  %v439_v63 = vld [vmem:[%s1851_s2 + $0x18] sm:$0xff]  ;;  %s1336_s10 = sshra.s32 %s1107_s29, 4  ;;  %s1337_s10 = int_to_ptr.hbm [resolvable:$true] %s1336_s10 }
  0x1f   : > { %284 = vadd.xlane.f32.xlu0 %v283_v10  ;;  %v458_v0 = vld [vmem:[%s1851_s2 + $0xb0] sm:$0xff]  ;;  %v457_v3 = vld [vmem:[%s1851_s2 + $0xa8] sm:$0xff]  ;;  %v456_v6 = vld [vmem:[%s1851_s2 + $0xa0] sm:$0xff]  ;;  %s1338_s11 = scalar_lea.hbm %s1337_s10, 32  ;;  %p1343_p3 = scmp.lt.s32.totalorder %s1337_s10, %s1855_s6 }
  0x20   : > { %v286_v12 = vsel %vm282_vm2, %v281_v11, 0.0  ;;  %342 = vmatpush.msra.mxu0 %v1509_v14  ;;  %504 = vmatpush.msra.mxu3 %v447_v22  ;;  %v409_v59 = vrot.slane %v408_v56, 4  ;;  %v438_v2 = vld [vmem:[%s1851_s2 + $0x10] sm:$0xff]  ;;  %v437_v5 = vld [vmem:[%s1851_s2 + $0x8] sm:$0xff]  ;;  %v455_v8 = vld [vmem:[%s1851_s2 + $0x98] sm:$0xff]  ;;  %p1339_p0 = scmp.ne.s32.totalorder %s1337_s10, %s1338_s11  ;;  %p1344_p4 = scmp.lt.s32.totalorder %s1342_s14, %s1338_s11 }
  0x21   : > { %v452_v15 = vld [vmem:[%s1851_s2 + $0x80] sm:$0xff] }
  0x22   : > { %520 = vmatpush.msrb.mxu0 %v467_v17  ;;  %505 = vmatpush.msra.mxu3 %v446_v46  ;;  %v410_v62 = vadd.f32 %v409_v59, %v408_v56  ;;  %v1619_v17 = vmul.f32 0.05, %v1509_v14  ;;  %v483_v14 = vld [vmem:[%s1851_s2 + $0x178] sm:$0xff]  ;;  %v468_v46 = vld [vmem:[%s1851_s2 + $0x100] sm:$0xff]  ;;  %v498_v56 = vld [vmem:[%s1851_s2 + $0x1f0] sm:$0xff]  ;;  %p1340_p1 = pnand %p1339_p0, %p1469_p5  ;;  %p1345_p7 = por %p1344_p4, %p1343_p3 }
  0x24   : > { %521 = vmatpush.msrb.mxu0 %v466_v19  ;;  %506 = vmatpush.msra.mxu3 %v445_v48  ;;  %v411_v1 = vrot.slane %v410_v62, 2  ;;  %v1622_v19 = vmul.f32 0.05, %v1505_v13  ;;  %v482_v13 = vld [vmem:[%s1851_s2 + $0x170] sm:$0xff]  ;;  %p1341_p2 = pneg %p1340_p1 }
  0x26   : > { %522 = vmatpush.msrb.mxu0 %v465_v47  ;;  %507 = vmatpush.msra.mxu3 %v444_v50  ;;  %v412_v4 = vadd.f32 %v411_v1, %v410_v62  ;;  %v497_v62 = vld [vmem:[%s1851_s2 + $0x1e8] sm:$0xff]  ;;  %v492_v1 = vld [vmem:[%s1851_s2 + $0x1c0] sm:$0xff]  ;;  %p1346_p8 = pnand %p1345_p7, %p1341_p2 }
  0x27   : > { %287 = vadd.xlane.f32.xlu0 %v286_v12  ;;  %v453_v12 = vld [vmem:[%s1851_s2 + $0x88] sm:$0xff] }
  0x28   : > { %523 = vmatpush.msrb.mxu0 %v464_v49  ;;  %508 = vmatpush.msra.mxu3 %v443_v52  ;;  %v413_v9 = vrot.slane %v412_v4, 1 }
  0x2a   : > { %524 = vmatpush.msrb.mxu0 %v463_v51  ;;  %509 = vmatpush.msra.mxu3 %v442_v54  ;;  %v414_v10 = vadd.f32 %v413_v9, %v412_v4  ;;  %v499_v54 = vld [vmem:[%s1851_s2 + $0x1f8] sm:$0xff]  ;;  %v489_v4 = vld [vmem:[%s1851_s2 + $0x1a8] sm:$0xff]  ;;  %v484_v9 = vld [vmem:[%s1851_s2 + $0x180] sm:$0xff] }
  0x2c   : > { %525 = vmatpush.msrb.mxu0 %v462_v53  ;;  %510 = vmatpush.msra.mxu3 %v441_v57 }
  0x2e   : > { %526 = vmatpush.msrb.mxu0 %v461_v55  ;;  %511 = vmatpush.msra.mxu3 %v440_v60 }
  0x30   : > { %527 = vmatpush.msrb.mxu0 %v460_v58  ;;  %512 = vmatpush.msra.mxu3 %v439_v63  ;;  %v495_v63 = vld [vmem:[%s1851_s2 + $0x1d8] sm:$0xff] }
  0x32   : > { %528 = vmatpush.msrb.mxu0 %v459_v61  ;;  %513 = vmatpush.msra.mxu3 %v438_v2  ;;  %v491_v2 = vld [vmem:[%s1851_s2 + $0x1b8] sm:$0xff] }
  0x34   : > { %529 = vmatpush.msrb.mxu0 %v458_v0  ;;  %514 = vmatpush.msra.mxu3 %v437_v5  ;;  %v493_v0 = vld [vmem:[%s1851_s2 + $0x1c8] sm:$0xff]  ;;  %v488_v5 = vld [vmem:[%s1851_s2 + $0x1a0] sm:$0xff] }
  0x36   : > { %530 = vmatpush.msrb.mxu0 %v457_v3  ;;  %v490_v3 = vld [vmem:[%s1851_s2 + $0x1b0] sm:$0xff] }
  0x38   : > { %531 = vmatpush.msrb.mxu0 %v456_v6  ;;  %v487_v6 = vld [vmem:[%s1851_s2 + $0x198] sm:$0xff] }
  0x3a   : > { %532 = vmatpush.msrb.mxu0 %v455_v8  ;;  %v485_v8 = vld [vmem:[%s1851_s2 + $0x188] sm:$0xff] }
  0x92   : > { %v285_v20 = vpop.xlane.xlu0 %284 }
  0x93   : > { %1270 = vrcp.f32 %v285_v20  ;;  %v300_v27 = vand.u32 2147483648, %v285_v20  ;;  %v298_v29 = vand.u32 2147483647, %v285_v20  ;;  %vm294_vm4 = vweird.f32 %v285_v20 }
  0x95   : > { %v301_v32 = vor.u32 1.1754944e-38, %v300_v27  ;;  %vm299_vm6 = vcmp.eq.f32.partialorder %v298_v29, 8.507059e+37 }
  0x99   : > { %v1271_v23 = vpop.eup %1270 }
  0x9a   : > { %v290_v24 = vmul.f32 %v1271_v23, %v285_v20  ;;  %v288_v25 = vpop.xlane.xlu0 %287  ;;  %vm295_vm3 = vweird.f32 %v1271_v23 }
  0x9b   : > { %1272 = vrcp.f32 %v288_v25  ;;  %vm296_vm5 = vmor %vm294_vm4, %vm295_vm3  ;;  %v315_v38 = vand.u32 2147483648, %v288_v25  ;;  %v313_v40 = vand.u32 2147483647, %v288_v25  ;;  %vm309_vm8 = vweird.f32 %v288_v25 }
  0x9c   : > { %v291_v26 = vsub.f32 1.0, %v290_v24 }
  0x9d   : > { %v316_v42 = vor.u32 1.1754944e-38, %v315_v38  ;;  %vm314_vm10 = vcmp.eq.f32.partialorder %v313_v40, 8.507059e+37  ;;  %v475_v38 = vld [vmem:[%s1851_s2 + $0x138] sm:$0xff]  ;;  %v473_v40 = vld [vmem:[%s1851_s2 + $0x128] sm:$0xff] }
  0x9e   : > { %v292_v28 = vmul.f32 %v1271_v23, %v291_v26 }
  0xa0   : > { %v293_v30 = vadd.f32 %v1271_v23, %v292_v28 }
  0xa1   : > { %v1273_v31 = vpop.eup %1272 }
  0xa2   : > { %v305_v33 = vmul.f32 %v1273_v31, %v288_v25  ;;  %v297_v34 = vsel %vm296_vm5, %v1271_v23, %v293_v30  ;;  %vm310_vm7 = vweird.f32 %v1273_v31 }
  0xa3   : > { %v302_v35 = vsel %vm299_vm6, %v301_v32, %v297_v34  ;;  %vm311_vm9 = vmor %vm309_vm8, %vm310_vm7  ;;  %v480_v32 = vld [vmem:[%s1851_s2 + $0x160] sm:$0xff]  ;;  %v478_v34 = vld [vmem:[%s1851_s2 + $0x150] sm:$0xff] }
  0xa4   : > { %v306_v36 = vsub.f32 1.0, %v305_v33  ;;  %v1533_v37 = vmul.f32 %v302_v35, %v280_v7  ;;  %v436_v7 = vld [vmem:[%s1851_s2] sm:$0xff]  ;;  %v479_v33 = vld [vmem:[%s1851_s2 + $0x158] sm:$0xff]  ;;  %v477_v35 = vld [vmem:[%s1851_s2 + $0x148] sm:$0xff] }
  0xa5   : > { %515 = vmatpush.msra.mxu3 %v436_v7  ;;  %v486_v7 = vld [vmem:[%s1851_s2 + $0x190] sm:$0xff] }
  0xa6   : > { %v307_v39 = vmul.f32 %v1273_v31, %v306_v36  ;;  %1190 = vmatmul.msk.f32.vlgmr.msra.gmra.mxu0 %vm282_vm2, %v1533_v37  ;;  %516 = vmatmul.f32.vlgmr.msra.gmra.mxu3 %v414_v10  ;;  %v476_v36 = vld [vmem:[%s1851_s2 + $0x140] sm:$0xff] }
  0xa7   : > { %v581_v10 = vld [vmem:[%s1852_s3] sm:$0xff] }
  0xa8   : > { %v308_v41 = vadd.f32 %v1273_v31, %v307_v39  ;;  %v474_v39 = vld [vmem:[%s1851_s2 + $0x130] sm:$0xff]  ;;  %583 = vst [vmem:[#allocation1] ss:$4 sm:$0xff] %v581_v10  ;;  %v785_v10 = vld [vmem:[#allocation2 + $0x80] sm:$0xff] }
  0xaa   : > { %v312_v43 = vsel %vm311_vm9, %v1273_v31, %v308_v41  ;;  %v481_v31 = vld [vmem:[%s1851_s2 + $0x168] sm:$0xff]  ;;  %v472_v41 = vld [vmem:[%s1851_s2 + $0x120] sm:$0xff] }
  0xab   : > { %v317_v44 = vsel %vm314_vm10, %v316_v42, %v312_v43  ;;  %v471_v42 = vld [vmem:[%s1851_s2 + $0x118] sm:$0xff]  ;;  %v470_v43 = vld [vmem:[%s1851_s2 + $0x110] sm:$0xff] }
  0xac   : > { %v1537_v45 = vmul.f32 %v317_v44, %v281_v11  ;;  %v454_v11 = vld [vmem:[%s1851_s2 + $0x90] sm:$0xff]  ;;  %v469_v44 = vld [vmem:[%s1851_s2 + $0x108] sm:$0xff] }
  0xad   : > { %533 = vmatpush.msrb.mxu0 %v454_v11 }
  0xae   : > { %1191 = vmatmul.msk.f32.gmra.mxu0 %vm282_vm2, %v1537_v45 }
  0xaf   : > { %534 = vmatpush.msrb.mxu0 %v453_v12  ;;  %v584_v12 = vld.sshfl [vmem:[#allocation1] sm:$0xff pattern:$0x73625140] }
  0xb0   : > { %1196 = vmatpush.msk.msrb.mxu3 %vm592_vm11, %v584_v12  ;;  %v843_v12 = vld [vmem:[#allocation2 + $0x250] sm:$0xff] }
  0xb1   : > { %535 = vmatpush.msrb.mxu0 %v452_v15 }
 0x123   : > { %v344_v16 = vpop.f32.mrf.mxu0 }
 0x124   : > { %v350_v18 = vmul.f32 0.95, %v344_v16 }
 0x126   : > { %v1625_v22 = vadd.f32 %v350_v18, %v1619_v17 }
 0x12b   : > { %v347_v20 = vpop.f32.mrf.mxu0 }
 0x12c   : > { %v351_v21 = vmul.f32 0.95, %v347_v20 }
 0x12e   : > { %v1628_v23 = vadd.f32 %v351_v21, %v1622_v19 }
 0x130   : > { %v415_v24 = vadd.f32 %v1628_v23, %v1625_v22  ;;  %368 = vmatpush.msra.mxu1 %v1628_v23 }
 0x132   : > { %v416_v25 = vrot.slane %v415_v24, 4  ;;  %369 = vmatpush.msra.mxu1 %v1625_v22 }
 0x133   : > { %1192 = vmatmul.msk.f32.vlgmr.msra.gmra.mxu1 %vm282_vm2, %v1533_v37 }
 0x134   : > { %v417_v26 = vadd.f32 %v416_v25, %v415_v24  ;;  %540 = vmatpush.msrb.mxu1 %v483_v14 }
 0x136   : > { %v418_v27 = vrot.slane %v417_v26, 2  ;;  %541 = vmatpush.msrb.mxu1 %v482_v13 }
 0x138   : > { %v419_v28 = vadd.f32 %v418_v27, %v417_v26  ;;  %542 = vmatpush.msrb.mxu1 %v481_v31  ;;  %v863_v31 = vld [vmem:[#allocation2 + $0x2f0] sm:$0xff] }
 0x13a   : > { %v420_v29 = vrot.slane %v419_v28, 1  ;;  %543 = vmatpush.msrb.mxu1 %v480_v32  ;;  %v829_v32 = vld [vmem:[#allocation2 + $0x1e0] sm:$0xff] }
 0x13b   : > { %1193 = vmatmul.msk.f32.gmra.mxu1 %vm282_vm2, %v1537_v45 }
 0x13c   : > { %v421_v30 = vadd.f32 %v420_v29, %v419_v28  ;;  %544 = vmatpush.msrb.mxu1 %v479_v33  ;;  %v587_v29 = vld.sshfl [vmem:[#allocation1 + $0x18] sm:$0xff pattern:$0x73625140]  ;;  %v861_v33 = vld [vmem:[#allocation2 + $0x2e0] sm:$0xff] }
 0x13e   : > { %536 = vmatmul.f32.vlgmr.msrb.gmra.mxu0 %v421_v30  ;;  %545 = vmatpush.msrb.mxu1 %v478_v34  ;;  %v585_v30 = vld.sshfl [vmem:[#allocation1 + $0x8] sm:$0xff pattern:$0x73625140]  ;;  %v827_v34 = vld [vmem:[#allocation2 + $0x1d0] sm:$0xff] }
 0x13f   : > { %1198 = vmatpush.msk.msra.mxu0 %vm592_vm11, %v585_v30  ;;  %v837_v30 = vld [vmem:[#allocation2 + $0x220] sm:$0xff] }
 0x140   : > { %546 = vmatpush.msrb.mxu1 %v477_v35  ;;  %v859_v35 = vld [vmem:[#allocation2 + $0x2d0] sm:$0xff] }
 0x142   : > { %547 = vmatpush.msrb.mxu1 %v476_v36  ;;  %v799_v36 = vld [vmem:[#allocation2 + $0xf0] sm:$0xff] }
 0x143   : > { %903 = vmatpush.msra.mxu3 %v799_v36  ;;  %v833_v36 = vld [vmem:[#allocation2 + $0x200] sm:$0xff] }
 0x144   : > { %548 = vmatpush.msrb.mxu1 %v475_v38  ;;  %v895_v38 = vld [vmem:[#allocation2 + $0x3f0] sm:$0xff] }
 0x146   : > { %549 = vmatpush.msrb.mxu1 %v474_v39  ;;  %v797_v39 = vld [vmem:[#allocation2 + $0xe0] sm:$0xff] }
 0x147   : > { %904 = vmatpush.msra.mxu3 %v797_v39  ;;  %v832_v39 = vld [vmem:[#allocation2 + $0x1f8] sm:$0xff] }
 0x148   : > { %550 = vmatpush.msrb.mxu1 %v473_v40  ;;  %v825_v40 = vld [vmem:[#allocation2 + $0x1c0] sm:$0xff] }
 0x14a   : > { %551 = vmatpush.msrb.mxu1 %v472_v41  ;;  %v857_v41 = vld [vmem:[#allocation2 + $0x2c0] sm:$0xff] }
 0x14c   : > { %552 = vmatpush.msrb.mxu1 %v471_v42  ;;  %v893_v42 = vld [vmem:[#allocation2 + $0x3e0] sm:$0xff] }
 0x14e   : > { %553 = vmatpush.msrb.mxu1 %v470_v43  ;;  %v795_v43 = vld [vmem:[#allocation2 + $0xd0] sm:$0xff] }
 0x14f   : > { %905 = vmatpush.msra.mxu3 %v795_v43  ;;  %v830_v43 = vld [vmem:[#allocation2 + $0x1e8] sm:$0xff] }
 0x150   : > { %554 = vmatpush.msrb.mxu1 %v469_v44  ;;  %v891_v44 = vld [vmem:[#allocation2 + $0x3d0] sm:$0xff] }
 0x152   : > { %555 = vmatpush.msrb.mxu1 %v468_v46  ;;  %v823_v46 = vld [vmem:[#allocation2 + $0x1b0] sm:$0xff] }
 0x1b0   : > { %v371_v47 = vpop.f32.mrf.mxu1 }
 0x1b1   : > { %v377_v48 = vmul.f32 0.95, %v371_v47  ;;  %v855_v47 = vld [vmem:[#allocation2 + $0x2b0] sm:$0xff] }
 0x1b3   : > { %v1687_v51 = vadd.f32 %v377_v48, %v1619_v17  ;;  %v793_v48 = vld [vmem:[#allocation2 + $0xc0] sm:$0xff] }
 0x1b4   : > { %906 = vmatpush.msra.mxu3 %v793_v48  ;;  %v828_v48 = vld [vmem:[#allocation2 + $0x1d8] sm:$0xff] }
 0x1b8   : > { %v374_v49 = vpop.f32.mrf.mxu1 }
 0x1b9   : > { %v378_v50 = vmul.f32 0.95, %v374_v49  ;;  %v889_v49 = vld [vmem:[#allocation2 + $0x3c0] sm:$0xff] }
 0x1bb   : > { %v1690_v52 = vadd.f32 %v378_v50, %v1622_v19  ;;  %v821_v50 = vld [vmem:[#allocation2 + $0x1a0] sm:$0xff] }
 0x1bd   : > { %v422_v53 = vadd.f32 %v1690_v52, %v1687_v51  ;;  %395 = vmatpush.msra.mxu2 %v1690_v52 }
 0x1bf   : > { %v423_v55 = vrot.slane %v422_v53, 4  ;;  %396 = vmatpush.msra.mxu2 %v1687_v51 }
 0x1c0   : > { %1194 = vmatmul.msk.f32.vlgmr.msra.gmra.mxu2 %vm282_vm2, %v1533_v37  ;;  %v496_v37 = vld [vmem:[%s1851_s2 + $0x1e0] sm:$0xff] }
 0x1c1   : > { %v424_v57 = vadd.f32 %v423_v55, %v422_v53  ;;  %560 = vmatpush.msrb.mxu2 %v499_v54  ;;  %v853_v53 = vld [vmem:[#allocation2 + $0x2a0] sm:$0xff]  ;;  %v819_v54 = vld [vmem:[#allocation2 + $0x190] sm:$0xff] }
 0x1c2   : > { %v851_v55 = vld [vmem:[#allocation2 + $0x290] sm:$0xff] }
 0x1c3   : > { %v425_v58 = vrot.slane %v424_v57, 2  ;;  %561 = vmatpush.msrb.mxu2 %v498_v56  ;;  %v517_v56 = vpop.f32.mrf.mxu3 }
 0x1c5   : > { %v426_v59 = vadd.f32 %v425_v58, %v424_v57  ;;  %562 = vmatpush.msrb.mxu2 %v497_v62  ;;  %v537_v57 = vpop.f32.mrf.mxu0 }
 0x1c7   : > { %v427_v60 = vrot.slane %v426_v59, 1  ;;  %563 = vmatpush.msrb.mxu2 %v496_v37 }
 0x1c8   : > { %1195 = vmatmul.msk.f32.gmra.mxu2 %vm282_vm2, %v1537_v45  ;;  %v494_v45 = vld [vmem:[%s1851_s2 + $0x1d0] sm:$0xff] }
 0x1c9   : > { %v428_v61 = vadd.f32 %v427_v60, %v426_v59  ;;  %564 = vmatpush.msrb.mxu2 %v495_v63  ;;  %v538_v59 = vadd.f32 %v537_v57, %v517_v56  ;;  %v791_v63 = vld [vmem:[#allocation2 + $0xb0] sm:$0xff]  ;;  %v858_v56 = vld [vmem:[#allocation2 + $0x2c8] sm:$0xff]  ;;  %v896_v57 = vld [vmem:[#allocation2 + $0x3f8] sm:$0xff] }
 0x1ca   : > { %907 = vmatpush.msra.mxu3 %v791_v63  ;;  %v854_v63 = vld [vmem:[#allocation2 + $0x2a8] sm:$0xff] }
 0x1cb   : > { %556 = vmatmul.f32.vlgmr.msrb.gmra.mxu1 %v428_v61  ;;  %565 = vmatpush.msrb.mxu2 %v494_v45  ;;  %v817_v45 = vld [vmem:[#allocation2 + $0x180] sm:$0xff] }
 0x1cd   : > { %566 = vmatpush.msrb.mxu2 %v493_v0  ;;  %v849_v0 = vld [vmem:[#allocation2 + $0x280] sm:$0xff] }
 0x1cf   : > { %567 = vmatpush.msrb.mxu2 %v492_v1  ;;  %v887_v1 = vld [vmem:[#allocation2 + $0x3b0] sm:$0xff] }
 0x1d1   : > { %568 = vmatpush.msrb.mxu2 %v491_v2  ;;  %v789_v2 = vld [vmem:[#allocation2 + $0xa0] sm:$0xff] }
 0x1d2   : > { %908 = vmatpush.msra.mxu3 %v789_v2  ;;  %v852_v2 = vld [vmem:[#allocation2 + $0x298] sm:$0xff] }
 0x1d3   : > { %569 = vmatpush.msrb.mxu2 %v490_v3  ;;  %v815_v3 = vld [vmem:[#allocation2 + $0x170] sm:$0xff] }
 0x1d5   : > { %570 = vmatpush.msrb.mxu2 %v489_v4  ;;  %v847_v4 = vld [vmem:[#allocation2 + $0x270] sm:$0xff] }
 0x1d7   : > { %571 = vmatpush.msrb.mxu2 %v488_v5  ;;  %v885_v5 = vld [vmem:[#allocation2 + $0x3a0] sm:$0xff] }
 0x1d9   : > { %572 = vmatpush.msrb.mxu2 %v487_v6  ;;  %v787_v6 = vld [vmem:[#allocation2 + $0x90] sm:$0xff] }
 0x1da   : > { %909 = vmatpush.msra.mxu3 %v787_v6 }
 0x1db   : > { %573 = vmatpush.msrb.mxu2 %v486_v7  ;;  %v813_v7 = vld [vmem:[#allocation2 + $0x160] sm:$0xff] }
 0x1dc   : > { %910 = vmatpush.msra.mxu3 %v785_v10 }
 0x1dd   : > { %574 = vmatpush.msrb.mxu2 %v485_v8  ;;  %v845_v8 = vld [vmem:[#allocation2 + $0x260] sm:$0xff] }
 0x1df   : > { %575 = vmatpush.msrb.mxu2 %v484_v9  ;;  %v883_v9 = vld [vmem:[#allocation2 + $0x390] sm:$0xff] }
 0x1e1   : > { %1202 = vmatpush.msk.msra.mxu2 %vm592_vm11, %v587_v29  ;;  %v805_v29 = vld [vmem:[#allocation2 + $0x120] sm:$0xff] }
 0x243   : > { %v398_v11 = vpop.f32.mrf.mxu2 }
 0x244   : > { %v404_v15 = vmul.f32 0.95, %v398_v11  ;;  %v811_v11 = vld [vmem:[#allocation2 + $0x150] sm:$0xff] }
 0x246   : > { %v1753_v20 = vadd.f32 %v404_v15, %v1619_v17  ;;  %v586_v17 = vld.sshfl [vmem:[#allocation1 + $0x10] sm:$0xff pattern:$0x73625140]  ;;  %v881_v15 = vld [vmem:[#allocation2 + $0x380] sm:$0xff] }
 0x247   : > { %1200 = vmatpush.msk.msra.mxu1 %vm592_vm11, %v586_v17  ;;  %v875_v17 = vld [vmem:[#allocation2 + $0x350] sm:$0xff] }
 0x248   : > { %v557_v58 = vpop.f32.mrf.mxu1 }
 0x249   : > { %949 = vmatpush.msrb.mxu1 %v863_v31  ;;  %v558_v60 = vadd.f32 %v557_v58, %v538_v59  ;;  %v803_v31 = vld [vmem:[#allocation2 + $0x110] sm:$0xff]  ;;  %v798_v58 = vld [vmem:[#allocation2 + $0xe8] sm:$0xff]  ;;  %v824_v59 = vld [vmem:[#allocation2 + $0x1b8] sm:$0xff] }
 0x24b   : > { %v401_v16 = vpop.f32.mrf.mxu2  ;;  %950 = vmatpush.msrb.mxu1 %v861_v33  ;;  %v873_v33 = vld [vmem:[#allocation2 + $0x340] sm:$0xff] }
 0x24c   : > { %v405_v18 = vmul.f32 0.95, %v401_v16  ;;  %v783_v16 = vld [vmem:[#allocation2 + $0x70] sm:$0xff] }
 0x24d   : > { %951 = vmatpush.msrb.mxu1 %v859_v35  ;;  %911 = vmatpush.msra.mxu3 %v783_v16  ;;  %v801_v35 = vld [vmem:[#allocation2 + $0x100] sm:$0xff]  ;;  %v848_v16 = vld [vmem:[#allocation2 + $0x278] sm:$0xff] }
 0x24e   : > { %v1756_v21 = vadd.f32 %v405_v18, %v1622_v19  ;;  %v831_v19 = vld [vmem:[#allocation2 + $0x1f0] sm:$0xff]  ;;  %v809_v18 = vld [vmem:[#allocation2 + $0x140] sm:$0xff] }
 0x24f   : > { %926 = vmatpush.msrb.mxu0 %v831_v19  ;;  %952 = vmatpush.msrb.mxu1 %v857_v41  ;;  %v777_v19 = vld [vmem:[#allocation2 + $0x40] sm:$0xff] }
 0x250   : > { %v429_v24 = vadd.f32 %v1756_v21, %v1753_v20  ;;  %v773_v41 = vld [vmem:[#allocation2 + $0x20] sm:$0xff] }
 0x251   : > { %927 = vmatpush.msrb.mxu0 %v829_v32  ;;  %953 = vmatpush.msrb.mxu1 %v855_v47  ;;  %v835_v32 = vld [vmem:[#allocation2 + $0x210] sm:$0xff] }
 0x252   : > { %v430_v14 = vrot.slane %v429_v24, 4  ;;  %v867_v47 = vld [vmem:[#allocation2 + $0x310] sm:$0xff] }
 0x253   : > { %928 = vmatpush.msrb.mxu0 %v827_v34  ;;  %954 = vmatpush.msrb.mxu1 %v853_v53  ;;  %v775_v34 = vld [vmem:[#allocation2 + $0x30] sm:$0xff]  ;;  %v865_v53 = vld [vmem:[#allocation2 + $0x300] sm:$0xff] }
 0x254   : > { %v431_v25 = vadd.f32 %v430_v14, %v429_v24  ;;  %v841_v24 = vld [vmem:[#allocation2 + $0x240] sm:$0xff]  ;;  %v879_v14 = vld [vmem:[#allocation2 + $0x370] sm:$0xff] }
 0x255   : > { %929 = vmatpush.msrb.mxu0 %v825_v40  ;;  %955 = vmatpush.msrb.mxu1 %v851_v55  ;;  %v864_v40 = vld [vmem:[#allocation2 + $0x2f8] sm:$0xff]  ;;  %v826_v55 = vld [vmem:[#allocation2 + $0x1c8] sm:$0xff] }
 0x256   : > { %v432_v13 = vrot.slane %v431_v25, 2 }
 0x257   : > { %930 = vmatpush.msrb.mxu0 %v823_v46  ;;  %956 = vmatpush.msrb.mxu1 %v849_v0  ;;  %v771_v46 = vld [vmem:[#allocation2 + $0x10] sm:$0xff]  ;;  %v794_v0 = vld [vmem:[#allocation2 + $0xc8] sm:$0xff] }
 0x258   : > { %v433_v26 = vadd.f32 %v432_v13, %v431_v25  ;;  %v781_v25 = vld [vmem:[#allocation2 + $0x60] sm:$0xff]  ;;  %v807_v13 = vld [vmem:[#allocation2 + $0x130] sm:$0xff] }
 0x259   : > { %931 = vmatpush.msrb.mxu0 %v821_v50  ;;  %957 = vmatpush.msrb.mxu1 %v847_v4  ;;  %v769_v50 = vld [vmem:[#allocation2] sm:$0xff]  ;;  %v792_v4 = vld [vmem:[#allocation2 + $0xb8] sm:$0xff] }
 0x25a   : > { %v434_v27 = vrot.slane %v433_v26, 1  ;;  %912 = vmatpush.msra.mxu3 %v781_v25  ;;  %v846_v25 = vld [vmem:[#allocation2 + $0x268] sm:$0xff] }
 0x25b   : > { %932 = vmatpush.msrb.mxu0 %v819_v54  ;;  %958 = vmatpush.msrb.mxu1 %v845_v8  ;;  %v800_v54 = vld [vmem:[#allocation2 + $0xf8] sm:$0xff] }
 0x25c   : > { %v435_v28 = vadd.f32 %v434_v27, %v433_v26  ;;  %v839_v26 = vld [vmem:[#allocation2 + $0x230] sm:$0xff]  ;;  %v877_v27 = vld [vmem:[#allocation2 + $0x360] sm:$0xff]  ;;  %v888_v8 = vld [vmem:[#allocation2 + $0x3b8] sm:$0xff] }
 0x25d   : > { %933 = vmatpush.msrb.mxu0 %v817_v45  ;;  %959 = vmatpush.msrb.mxu1 %v843_v12  ;;  %v892_v45 = vld [vmem:[#allocation2 + $0x3d8] sm:$0xff]  ;;  %v790_v12 = vld [vmem:[#allocation2 + $0xa8] sm:$0xff] }
 0x25e   : > { %576 = vmatmul.f32.vlgmr.msrb.gmra.mxu2 %v435_v28  ;;  %v779_v28 = vld [vmem:[#allocation2 + $0x50] sm:$0xff] }
 0x25f   : > { %972 = vmatpush.msrb.mxu2 %v895_v38  ;;  %934 = vmatpush.msrb.mxu0 %v815_v3  ;;  %v871_v38 = vld [vmem:[#allocation2 + $0x330] sm:$0xff]  ;;  %v890_v3 = vld [vmem:[#allocation2 + $0x3c8] sm:$0xff] }
 0x260   : > { %960 = vmatpush.msrb.mxu1 %v841_v24  ;;  %913 = vmatpush.msra.mxu3 %v779_v28  ;;  %v788_v24 = vld [vmem:[#allocation2 + $0x98] sm:$0xff] }
 0x261   : > { %973 = vmatpush.msrb.mxu2 %v893_v42  ;;  %935 = vmatpush.msrb.mxu0 %v813_v7  ;;  %v869_v42 = vld [vmem:[#allocation2 + $0x320] sm:$0xff]  ;;  %v850_v7 = vld [vmem:[#allocation2 + $0x288] sm:$0xff] }
 0x262   : > { %961 = vmatpush.msrb.mxu1 %v839_v26  ;;  %914 = vmatpush.msra.mxu3 %v777_v19  ;;  %v786_v26 = vld [vmem:[#allocation2 + $0x88] sm:$0xff] }
 0x263   : > { %974 = vmatpush.msrb.mxu2 %v891_v44  ;;  %936 = vmatpush.msrb.mxu0 %v811_v11  ;;  %v862_v44 = vld [vmem:[#allocation2 + $0x2e8] sm:$0xff] }
 0x264   : > { %962 = vmatpush.msrb.mxu1 %v837_v30  ;;  %915 = vmatpush.msra.mxu3 %v775_v34  ;;  %v882_v30 = vld [vmem:[#allocation2 + $0x388] sm:$0xff] }
 0x265   : > { %975 = vmatpush.msrb.mxu2 %v889_v49  ;;  %937 = vmatpush.msrb.mxu0 %v809_v18  ;;  %v860_v49 = vld [vmem:[#allocation2 + $0x2d8] sm:$0xff]  ;;  %v886_v18 = vld [vmem:[#allocation2 + $0x3a8] sm:$0xff] }
 0x266   : > { %963 = vmatpush.msrb.mxu1 %v835_v32  ;;  %916 = vmatpush.msra.mxu3 %v773_v41  ;;  %v784_v32 = vld [vmem:[#allocation2 + $0x78] sm:$0xff]  ;;  %v842_v34 = vld [vmem:[#allocation2 + $0x248] sm:$0xff] }
 0x267   : > { %976 = vmatpush.msrb.mxu2 %v887_v1  ;;  %938 = vmatpush.msrb.mxu0 %v807_v13  ;;  %v820_v1 = vld [vmem:[#allocation2 + $0x198] sm:$0xff] }
 0x268   : > { %964 = vmatpush.msrb.mxu1 %v833_v36  ;;  %917 = vmatpush.msra.mxu3 %v771_v46  ;;  %v884_v13 = vld [vmem:[#allocation2 + $0x398] sm:$0xff] }
 0x269   : > { %977 = vmatpush.msrb.mxu2 %v885_v5  ;;  %939 = vmatpush.msrb.mxu0 %v805_v29  ;;  %v818_v5 = vld [vmem:[#allocation2 + $0x188] sm:$0xff]  ;;  %v844_v29 = vld [vmem:[#allocation2 + $0x258] sm:$0xff] }
 0x26a   : > { %918 = vmatpush.msra.mxu3 %v769_v50  ;;  %v880_v36 = vld [vmem:[#allocation2 + $0x378] sm:$0xff]  ;;  %v778_v50 = vld [vmem:[#allocation2 + $0x48] sm:$0xff] }
 0x26b   : > { %978 = vmatpush.msrb.mxu2 %v883_v9  ;;  %940 = vmatpush.msrb.mxu0 %v803_v31  ;;  %v808_v41 = vld [vmem:[#allocation2 + $0x138] sm:$0xff] }
 0x26c   : > { %v780_v46 = vld [vmem:[#allocation2 + $0x58] sm:$0xff] }
 0x26d   : > { %979 = vmatpush.msrb.mxu2 %v881_v15  ;;  %941 = vmatpush.msrb.mxu0 %v801_v35  ;;  %v816_v15 = vld [vmem:[#allocation2 + $0x178] sm:$0xff] }
 0x26f   : > { %980 = vmatpush.msrb.mxu2 %v879_v14  ;;  %v814_v14 = vld [vmem:[#allocation2 + $0x168] sm:$0xff] }
 0x271   : > { %981 = vmatpush.msrb.mxu2 %v877_v27  ;;  %v812_v27 = vld [vmem:[#allocation2 + $0x158] sm:$0xff] }
 0x273   : > { %982 = vmatpush.msrb.mxu2 %v875_v17 }
 0x275   : > { %983 = vmatpush.msrb.mxu2 %v873_v33  ;;  %v810_v33 = vld [vmem:[#allocation2 + $0x148] sm:$0xff] }
 0x277   : > { %984 = vmatpush.msrb.mxu2 %v871_v38 }
 0x279   : > { %985 = vmatpush.msrb.mxu2 %v869_v42  ;;  %v840_v42 = vld [vmem:[#allocation2 + $0x238] sm:$0xff] }
 0x27b   : > { %986 = vmatpush.msrb.mxu2 %v867_v47  ;;  %v806_v47 = vld [vmem:[#allocation2 + $0x128] sm:$0xff] }
 0x27d   : > { %987 = vmatpush.msrb.mxu2 %v865_v53  ;;  %v804_v53 = vld [vmem:[#allocation2 + $0x118] sm:$0xff] }
 0x2e1   : > { %v577_v61 = vpop.f32.mrf.mxu2 }
 0x2e2   : > { %v578_v62 = vadd.f32 %v577_v61, %v558_v60  ;;  %v856_v60 = vld [vmem:[#allocation2 + $0x2b8] sm:$0xff]  ;;  %v894_v61 = vld [vmem:[#allocation2 + $0x3e8] sm:$0xff] }
 0x2e4   : > { %v580_v37 = vmax.f32 %v578_v62, 0.0  ;;  %v796_v62 = vld [vmem:[#allocation2 + $0xd8] sm:$0xff] }
 0x2e6   : > { %1197 = vmatmul.msk.f32.vlgmr.msrb.gmra.mxu3 %vm588_vm12, %v580_v37  ;;  %1199 = vmatmul.msk.f32.vlgmr.msra.gmra.mxu0 %vm588_vm12, %v580_v37 }
 0x2e7   : > { %1201 = vmatmul.msk.f32.vlgmr.msra.gmra.mxu1 %vm588_vm12, %v580_v37  ;;  %1203 = vmatmul.msk.f32.vlgmr.msra.gmra.mxu2 %vm588_vm12, %v580_v37  ;;  %v822_v37 = vld [vmem:[#allocation2 + $0x1a8] sm:$0xff] }
 0x2e8   : > { %1018 = vmatpush.msra.mxu0 %v832_v39  ;;  %1041 = vmatpush.msra.mxu1 %v864_v40  ;;  %v782_v40 = vld [vmem:[#allocation2 + $0x68] sm:$0xff] }
 0x2e9   : > { %995 = vmatpush.msrb.mxu3 %v800_v54  ;;  %1064 = vmatpush.msra.mxu2 %v896_v57  ;;  %v836_v54 = vld [vmem:[#allocation2 + $0x218] sm:$0xff] }
 0x2ea   : > { %1019 = vmatpush.msra.mxu0 %v830_v43  ;;  %1042 = vmatpush.msra.mxu1 %v862_v44  ;;  %v878_v44 = vld [vmem:[#allocation2 + $0x368] sm:$0xff] }
 0x2eb   : > { %996 = vmatpush.msrb.mxu3 %v798_v58  ;;  %1065 = vmatpush.msra.mxu2 %v894_v61  ;;  %v834_v61 = vld [vmem:[#allocation2 + $0x208] sm:$0xff] }
 0x2ec   : > { %1020 = vmatpush.msra.mxu0 %v828_v48  ;;  %1043 = vmatpush.msra.mxu1 %v860_v49  ;;  %v838_v48 = vld [vmem:[#allocation2 + $0x228] sm:$0xff]  ;;  %v876_v49 = vld [vmem:[#allocation2 + $0x358] sm:$0xff] }
 0x2ed   : > { %997 = vmatpush.msrb.mxu3 %v796_v62  ;;  %1066 = vmatpush.msra.mxu2 %v892_v45  ;;  %v774_v45 = vld [vmem:[#allocation2 + $0x28] sm:$0xff] }
 0x2ee   : > { %1021 = vmatpush.msra.mxu0 %v826_v55  ;;  %1044 = vmatpush.msra.mxu1 %v858_v56  ;;  %v874_v55 = vld [vmem:[#allocation2 + $0x348] sm:$0xff] }
 0x2ef   : > { %998 = vmatpush.msrb.mxu3 %v794_v0  ;;  %1067 = vmatpush.msra.mxu2 %v890_v3  ;;  %v870_v0 = vld [vmem:[#allocation2 + $0x328] sm:$0xff]  ;;  %v772_v3 = vld [vmem:[#allocation2 + $0x18] sm:$0xff] }
 0x2f0   : > { %1022 = vmatpush.msra.mxu0 %v824_v59  ;;  %1045 = vmatpush.msra.mxu1 %v856_v60  ;;  %v776_v59 = vld [vmem:[#allocation2 + $0x38] sm:$0xff]  ;;  %v802_v60 = vld [vmem:[#allocation2 + $0x108] sm:$0xff] }
 0x2f1   : > { %999 = vmatpush.msrb.mxu3 %v792_v4  ;;  %1068 = vmatpush.msra.mxu2 %v888_v8 }
 0x2f2   : > { %1023 = vmatpush.msra.mxu0 %v822_v37  ;;  %1046 = vmatpush.msra.mxu1 %v854_v63  ;;  %v872_v37 = vld [vmem:[#allocation2 + $0x338] sm:$0xff] }
 0x2f3   : > { %1000 = vmatpush.msrb.mxu3 %v790_v12  ;;  %1069 = vmatpush.msra.mxu2 %v886_v18 }
 0x2f4   : > { %1024 = vmatpush.msra.mxu0 %v820_v1  ;;  %1047 = vmatpush.msra.mxu1 %v852_v2 }
 0x2f5   : > { %1001 = vmatpush.msrb.mxu3 %v788_v24  ;;  %1070 = vmatpush.msra.mxu2 %v884_v13 }
 0x2f6   : > { %1025 = vmatpush.msra.mxu0 %v818_v5  ;;  %1048 = vmatpush.msra.mxu1 %v850_v7  ;;  %v868_v5 = vld [vmem:[#allocation2 + $0x318] sm:$0xff] }
 0x2f7   : > { %1002 = vmatpush.msrb.mxu3 %v786_v26  ;;  %1071 = vmatpush.msra.mxu2 %v882_v30 }
 0x2f8   : > { %1026 = vmatpush.msra.mxu0 %v816_v15  ;;  %1049 = vmatpush.msra.mxu1 %v848_v16  ;;  %v866_v15 = vld [vmem:[#allocation2 + $0x308] sm:$0xff] }
 0x2f9   : > { %1003 = vmatpush.msrb.mxu3 %v784_v32  ;;  %1072 = vmatpush.msra.mxu2 %v880_v36 }
 0x2fa   : > { %1027 = vmatpush.msra.mxu0 %v814_v14  ;;  %1050 = vmatpush.msra.mxu1 %v846_v25 }
 0x2fb   : > { %1004 = vmatpush.msrb.mxu3 %v782_v40  ;;  %1073 = vmatpush.msra.mxu2 %v878_v44 }
 0x2fc   : > { %1028 = vmatpush.msra.mxu0 %v812_v27  ;;  %1051 = vmatpush.msra.mxu1 %v844_v29 }
 0x2fd   : > { %1005 = vmatpush.msrb.mxu3 %v780_v46  ;;  %1074 = vmatpush.msra.mxu2 %v876_v49 }
 0x2fe   : > { %1029 = vmatpush.msra.mxu0 %v810_v33  ;;  %1052 = vmatpush.msra.mxu1 %v842_v34 }
 0x2ff   : > { %1006 = vmatpush.msrb.mxu3 %v778_v50  ;;  %1075 = vmatpush.msra.mxu2 %v874_v55 }
 0x300   : > { %1030 = vmatpush.msra.mxu0 %v808_v41  ;;  %1053 = vmatpush.msra.mxu1 %v840_v42 }
 0x301   : > { %1007 = vmatpush.msrb.mxu3 %v776_v59  ;;  %1076 = vmatpush.msra.mxu2 %v872_v37 }
 0x302   : > { %1031 = vmatpush.msra.mxu0 %v806_v47  ;;  %1054 = vmatpush.msra.mxu1 %v838_v48 }
 0x303   : > { %1008 = vmatpush.msrb.mxu3 %v774_v45  ;;  %1077 = vmatpush.msra.mxu2 %v870_v0 }
 0x304   : > { %1032 = vmatpush.msra.mxu0 %v804_v53  ;;  %1055 = vmatpush.msra.mxu1 %v836_v54 }
 0x305   : > { %1009 = vmatpush.msrb.mxu3 %v772_v3  ;;  %1078 = vmatpush.msra.mxu2 %v868_v5 }
 0x306   : > { %1033 = vmatpush.msra.mxu0 %v802_v60  ;;  %1056 = vmatpush.msra.mxu1 %v834_v61  ;;  %v1291_v61 = vld [vmem:[%s1502_s9 + $0x8] sm:$0xff] }
 0x307   : > { %1079 = vmatpush.msra.mxu2 %v866_v15 }
 0x363   : > { %v638_v6 = vpop.f32.mrf.mxu0 }
 0x364   : > { %v1205_v9 = vmul.f32 -1.442695, %v638_v6  ;;  %v658_v10 = vpop.f32.mrf.mxu1 }
 0x365   : > { %v1206_v11 = vmul.f32 -1.442695, %v658_v10 }
 0x366   : > { %1274 = vpow2.f32 %v1205_v9  ;;  %v770_v9 = vld [vmem:[#allocation2 + $0x8] sm:$0xff] }
 0x367   : > { %1276 = vpow2.f32 %v1206_v11  ;;  %1010 = vmatpush.msrb.mxu3 %v770_v9 }
 0x369   : > { %v618_v28 = vpop.f32.mrf.mxu3 }
 0x36a   : > { %v1204_v17 = vmul.f32 -1.442695, %v618_v28  ;;  %v678_v19 = vpop.f32.mrf.mxu2 }
 0x36b   : > { %v1207_v31 = vmul.f32 -1.442695, %v678_v19 }
 0x36c   : > { %v1275_v35 = vpop.eup %1274  ;;  %1278 = vpow2.f32 %v1204_v17 }
 0x36d   : > { %v1277_v38 = vpop.eup %1276  ;;  %v1763_v39 = vadd.f32 1.0, %v1275_v35  ;;  %1280 = vpow2.f32 %v1207_v31 }
 0x36e   : > { %v1765_v43 = vadd.f32 1.0, %v1277_v38 }
 0x36f   : > { %1282 = vrcp.f32 %v1763_v39  ;;  %v721_v7 = vand.u32 2147483647, %v1763_v39  ;;  %v723_v8 = vand.u32 2147483648, %v1763_v39  ;;  %vm717_vm14 = vweird.f32 %v1763_v39 }
 0x370   : > { %1284 = vrcp.f32 %v1765_v43  ;;  %v736_v11 = vand.u32 2147483647, %v1765_v43  ;;  %v738_v12 = vand.u32 2147483648, %v1765_v43  ;;  %vm732_vm15 = vweird.f32 %v1765_v43 }
 0x371   : > { %vm722_vm1 = vcmp.eq.f32.partialorder %v721_v7, 8.507059e+37  ;;  %v724_v26 = vor.u32 1.1754944e-38, %v723_v8 }
 0x372   : > { %v1279_v56 = vpop.eup %1278  ;;  %vm737_vm3 = vcmp.eq.f32.partialorder %v736_v11, 8.507059e+37  ;;  %v739_v29 = vor.u32 1.1754944e-38, %v738_v12 }
 0x373   : > { %v1281_v57 = vpop.eup %1280  ;;  %v1769_v58 = vadd.f32 1.0, %v1279_v56 }
 0x374   : > { %v1771_v62 = vadd.f32 1.0, %v1281_v57 }
 0x375   : > { %v1283_v63 = vpop.eup %1282  ;;  %1286 = vrcp.f32 %v1769_v58  ;;  %v706_v19 = vand.u32 2147483647, %v1769_v58  ;;  %v708_v31 = vand.u32 2147483648, %v1769_v58  ;;  %vm702_vm7 = vweird.f32 %v1769_v58 }
 0x376   : > { %v1285_v1 = vpop.eup %1284  ;;  %v713_v2 = vmul.f32 %v1283_v63, %v1763_v39  ;;  %1288 = vrcp.f32 %v1771_v62  ;;  %vm718_vm13 = vweird.f32 %v1283_v63  ;;  %v753_v35 = vand.u32 2147483648, %v1771_v62 }
 0x377   : > { %v728_v4 = vmul.f32 %v1285_v1, %v1765_v43  ;;  %vm733_vm0 = vweird.f32 %v1285_v1  ;;  %vm719_vm2 = vmor %vm717_vm14, %vm718_vm13  ;;  %v751_v42 = vand.u32 2147483647, %v1771_v62  ;;  %v709_v47 = vor.u32 1.1754944e-38, %v708_v31 }
 0x378   : > { %v714_v6 = vsub.f32 1.0, %v713_v2  ;;  %vm734_vm4 = vmor %vm732_vm15, %vm733_vm0  ;;  %vm747_vm9 = vweird.f32 %v1771_v62  ;;  %vm707_vm10 = vcmp.eq.f32.partialorder %v706_v19, 8.507059e+37  ;;  %v754_v50 = vor.u32 1.1754944e-38, %v753_v35 }
 0x379   : > { %v729_v10 = vsub.f32 1.0, %v728_v4  ;;  %vm752_vm12 = vcmp.eq.f32.partialorder %v751_v42, 8.507059e+37 }
 0x37a   : > { %v715_v16 = vmul.f32 %v1283_v63, %v714_v6 }
 0x37b   : > { %v1287_v18 = vpop.eup %1286  ;;  %v730_v24 = vmul.f32 %v1285_v1, %v729_v10 }
 0x37c   : > { %v1289_v14 = vpop.eup %1288  ;;  %v698_v25 = vmul.f32 %v1287_v18, %v1769_v58  ;;  %v716_v13 = vadd.f32 %v1283_v63, %v715_v16  ;;  %vm703_vm5 = vweird.f32 %v1287_v18 }
 0x37d   : > { %v743_v27 = vmul.f32 %v1289_v14, %v1771_v62  ;;  %v731_v28 = vadd.f32 %v1285_v1, %v730_v24  ;;  %vm748_vm6 = vweird.f32 %v1289_v14  ;;  %vm704_vm8 = vmor %vm702_vm7, %vm703_vm5 }
 0x37e   : > { %v699_v30 = vsub.f32 1.0, %v698_v25  ;;  %v720_v17 = vsel %vm719_vm2, %v1283_v63, %v716_v13  ;;  %vm749_vm11 = vmor %vm747_vm9, %vm748_vm6 }
 0x37f   : > { %v744_v32 = vsub.f32 1.0, %v743_v27  ;;  %v725_v33 = vsel %vm722_vm1, %v724_v26, %v720_v17  ;;  %v735_v34 = vsel %vm734_vm4, %v1285_v1, %v731_v28 }
 0x380   : > { %v700_v36 = vmul.f32 %v1287_v18, %v699_v30  ;;  %v758_v38 = vperm.slane %v725_v33, 0  ;;  %v740_v39 = vsel %vm737_vm3, %v739_v29, %v735_v34 }
 0x381   : > { %v745_v40 = vmul.f32 %v1289_v14, %v744_v32  ;;  %v759_v41 = vperm.slane %v740_v39, 0 }
 0x382   : > { %v762_v43 = vmul.f32 %v758_v38, %v1625_v22  ;;  %v701_v44 = vadd.f32 %v1287_v18, %v700_v36  ;;  %v766_v59 = vmul.f32 %v758_v38, %v1628_v23  ;;  %v897_v23 = vld [vmem:[%s1854_s5] sm:$0x3] }
 0x383   : > { %v763_v46 = vmul.f32 %v759_v41, %v1687_v51  ;;  %v746_v48 = vadd.f32 %v1289_v14, %v745_v40  ;;  %v1290_v51 = vld [vmem:[%s1502_s9] sm:$0xff]  ;;  %v767_v60 = vmul.f32 %v759_v41, %v1690_v52  ;;  %s259_s9 = sand.u32 1, %s1380_s22   ;;  %v900_v11 = vperm.slane %v897_v23, 1 }
 0x384   : > { %942 = vmatmul.f32.vlgmr.msrb.gmra.mxu0 %v762_v43  ;;  %v705_v49 = vsel %vm704_vm8, %v1287_v18, %v701_v44  ;;  %s1187_s16 = sshll.u32 %s259_s9, 5  ;;  %s1092_s25 = scalar_lea.sflag [#allocation4], %s259_s9 }
 0x385   : > { %965 = vmatmul.f32.vlgmr.msrb.gmra.mxu1 %v763_v46  ;;  %v710_v53 = vsel %vm707_vm10, %v709_v47, %v705_v49  ;;  %v750_v22 = vsel %vm749_vm11, %v1289_v14, %v746_v48  ;;  %s1809_s17 = scalar_lea.vmem [#allocation5], %s1187_s16 }
 0x386   : > { %v757_v54 = vperm.slane %v710_v53, 0  ;;  %v755_v55 = vsel %vm752_vm12, %v754_v50, %v750_v22  ;;  %s1104_s28 = sshll.u32 %s1809_s17, 4  ;;  %s1105_s28 = int_to_ptr.vmem [resolvable:$true] %s1104_s28 }
 0x387   : > { %v760_v56 = vperm.slane %v755_v55, 0 }
 0x388   : > { %v761_v57 = vmul.f32 %v1290_v51, %v757_v54  ;;  %v765_v62 = vmul.f32 %v1291_v61, %v757_v54 }
 0x389   : > { %v764_v58 = vmul.f32 %v760_v56, %v1753_v20  ;;  %v768_v37 = vmul.f32 %v760_v56, %v1756_v21  ;;  %v899_v20 = vperm.slane %v897_v23, 0 }
 0x38a   : > { %919 = vmatmul.f32.vlgmr.msra.gmra.mxu3 %v761_v57 }
 0x38b   : > { %988 = vmatmul.f32.vlgmr.msrb.gmra.mxu2 %v764_v58 }
 0x38c   : > { %945 = vmatmul.f32.gmra.mxu0 %v766_v59 }
 0x38d   : > { %968 = vmatmul.f32.gmra.mxu1 %v767_v60 }
 0x392   : > { %922 = vmatmul.f32.gmra.mxu3 %v765_v62 }
 0x393   : > { %991 = vmatmul.f32.gmra.mxu2 %v768_v37 }
 0x394   : > { %1034 = vmatmul.f32.vlgmr.msra.gmra.mxu0 %v762_v43 }
 0x395   : > { %1057 = vmatmul.f32.vlgmr.msra.gmra.mxu1 %v763_v46 }
 0x39a   : > { %1011 = vmatmul.f32.vlgmr.msrb.gmra.mxu3 %v761_v57 }
 0x39b   : > { %1080 = vmatmul.f32.vlgmr.msra.gmra.mxu2 %v764_v58 }
 0x39c   : > { %1037 = vmatmul.f32.gmra.mxu0 %v766_v59 }
 0x39d   : > { %1060 = vmatmul.f32.gmra.mxu1 %v767_v60 }
 0x3a2   : > { %1014 = vmatmul.f32.gmra.mxu3 %v765_v62 }
 0x3a3   : > { %1083 = vmatmul.f32.gmra.mxu2 %v768_v37 }
 0x401   : > { %v943_v52 = vpop.f32.mrf.mxu0 }
 0x402   : > { %v966_v63 = vpop.f32.mrf.mxu1 }
 0x409   : > { %v946_v3 = vpop.f32.mrf.mxu0 }
 0x40a   : > { %v969_v5 = vpop.f32.mrf.mxu1 }
 0x40d   : > { %v920_v21 = vpop.f32.mrf.mxu3 }
 0x40e   : > { %v921_v45 = vadd.f32 %v920_v21, %v899_v20  ;;  %v989_v0 = vpop.f32.mrf.mxu2 }
 0x410   : > { %v944_v1 = vadd.f32 %v943_v52, %v921_v45 }
 0x411   : > { %v1035_v15 = vpop.f32.mrf.mxu0 }
 0x412   : > { %v967_v2 = vadd.f32 %v966_v63, %v944_v1  ;;  %v1058_v24 = vpop.f32.mrf.mxu1 }
 0x414   : > { %v990_v4 = vadd.f32 %v989_v0, %v967_v2 }
 0x415   : > { %v923_v6 = vpop.f32.mrf.mxu3 }
 0x416   : > { %1087 = vst [vmem:[%s1809_s17] sm:$0xff] %v990_v4  ;;  %v924_v7 = vadd.f32 %v923_v6, %v899_v20  ;;  %v992_v8 = vpop.f32.mrf.mxu2 }
 0x418   : > { %v947_v9 = vadd.f32 %v946_v3, %v924_v7 }
 0x419   : > { %v1038_v29 = vpop.f32.mrf.mxu0 }
 0x41a   : > { %v970_v10 = vadd.f32 %v969_v5, %v947_v9  ;;  %v1061_v17 = vpop.f32.mrf.mxu1 }
 0x41c   : > { %v993_v12 = vadd.f32 %v992_v8, %v970_v10 }
 0x41d   : > { %v1012_v16 = vpop.f32.mrf.mxu3 }
 0x41e   : > { %1089 = vst [vmem:[%s1809_s17 + $0x10] sm:$0xff] %v993_v12  ;;  %v1013_v18 = vadd.f32 %v1012_v16, %v900_v11  ;;  %v1081_v25 = vpop.f32.mrf.mxu2 }
 0x420   : > { %v1036_v14 = vadd.f32 %v1035_v15, %v1013_v18 }
 0x422   : > { %v1059_v13 = vadd.f32 %v1058_v24, %v1036_v14 }
 0x424   : > { %v1082_v26 = vadd.f32 %v1081_v25, %v1059_v13 }
 0x425   : > { %v1015_v27 = vpop.f32.mrf.mxu3 }
 0x426   : > { %1088 = vst [vmem:[%s1809_s17 + $0x8] sm:$0xff] %v1082_v26  ;;  %v1016_v28 = vadd.f32 %v1015_v27, %v900_v11  ;;  %v1084_v31 = vpop.f32.mrf.mxu2 }
 0x428   : > { %v1039_v30 = vadd.f32 %v1038_v29, %v1016_v28 }
 0x42a   : > { %v1062_v19 = vadd.f32 %v1061_v17, %v1039_v30 }
 0x42c   : > { %v1085_v32 = vadd.f32 %v1084_v31, %v1062_v19 }
 0x42e   : > { %1090 = vst [vmem:[%s1809_s17 + $0x18] sm:$0xff] %v1085_v32 }
 0x42f   : > { %1349 = shalt.err (!%p1346_p8)
}
 0x430   : > { %s1394_s9 = smov 256   ;;  %s1395_s17 = smov 16  }
 0x431   : > { %1219 = dma.vmem_to_hbm [thread:$0]  (%p1469_p5), %s1105_s28, 512, %s1107_s29, %s1092_s25, %s1394_s9, %s1394_s9, %s1395_s17  }
 0x432 PF: > { %p1231_p9 = scmp.ge.s32.totalorder %s1388_s24, 2  ;;  %s1121_s18 = sand.u32 1, %s1376_s21  }
 0x433   : > { %s1122_s19 = scalar_lea.sflag [#allocation4], %s1121_s18 }
 0x434   : > { %p1226_p10 = pnand %p1231_p9, %p1473_p6 }
 0x436   : > { %p1227_p11 = pneg %p1226_p10 }
 0x438   : > { %1371 = dma.done.wait (%p1227_p11), %s1122_s19, 512  }
 0x439   : > { %1373 = vsyncadd (%p1227_p11), %s1122_s19, 4294966784  ;;  %p17_p12 = scmp.ge.s32.totalorder %s1456_s27, 4   ;;  %s1858_s21 = smov %s1380_s22 }
 0x43a   : > { %s1859_s22 = smov %s1384_s23  ;;  %s1860_s23 = smov %s1467_s30 }
 0x43b   : > { %s1861_s24 = smov %s1456_s27  ;;  %19 = sbr.rel (!%p17_p12) target bundleno = 4 (0x4), region = 84 }
 0x440   :  { %1128 = vsyncpa [#allocation3], 1 }
 0x441   :  { %1130 = vsyncpa [#allocation3 + $0x1], 1 }
 0x442   :  { %1131 = vsyncpa [#allocation4], 1 }
 0x443   :  { %1133 = vsyncpa [#allocation4 + $0x1], 1 }

</bundles_post_ra>
